<compile_context>
chip_gen: v6e
topology: v6e:2x2x1
jax: 0.10.0
libtpu: 0.0.40
codegen_flags: <defaults>
</compile_context>

<pallas_src>
import numpy as np
import jax
import jax.numpy as jnp
from jax.experimental import pallas as pl
from jax.experimental.pallas import tpu as pltpu

LN_EPS = 1e-5


def _make_kernel(TB, L, D, Dp, Eb, Es, Ea):
    f32, bf16 = jnp.float32, jnp.bfloat16
    TBL, TBEb, TBEs, TBEa = TB * L, TB * Eb, TB * Es, TB * Ea
    inv_d = 1.0 / D

    def layernorm(v, gamma, beta):
        # Stats over the D real features only; padded lanes of v are exactly zero,
        # and gamma/beta are zero-padded, so padded lanes of the output stay zero.
        mu = jnp.sum(v, axis=-1, keepdims=True) * inv_d
        ex2 = jnp.sum(v * v, axis=-1, keepdims=True) * inv_d
        rstd = jax.lax.rsqrt(ex2 - mu * mu + LN_EPS)
        return (v - mu) * rstd * gamma + beta

    def onehot_lane(col, rows, cols):        # col: (rows, 1) -> one-hot along lanes
        i = jax.lax.broadcasted_iota(jnp.int32, (rows, cols), 1)
        return (i == col).astype(bf16)

    def onehot_sub(row, rows, cols):         # row: (1, cols) -> one-hot along sublanes
        i = jax.lax.broadcasted_iota(jnp.int32, (rows, cols), 0)
        return (i == row).astype(bf16)

    def kernel(x_ref, edge_ref, idxr_ref, idxc_ref, prm_ref, wts_ref, out_ref):
        x = x_ref[...]                                        # (TBL, Dp) f32

        # ---- static views of the consolidated inputs -------------------
        bond_x = edge_ref[0:TBEb, :]                          # (TBEb, Dp) f32
        sc_x = edge_ref[TBEb:TBEb + TBEs, :]                  # (TBEs, Dp)
        ang_x = edge_ref[TBEb + TBEs:TBEb + TBEs + TBEa, :]   # (TBEa, Dp)

        sb_row = idxr_ref[0:1, 0:TBEb]                        # scatter (bond)
        ss_row = idxr_ref[8:9, 0:TBEs]                        # scatter (sc)
        ab_row = idxr_ref[16:17, 0:TBEa]                      # angle -> bond
        gb_col = idxc_ref[0:TBEb, :]                          # gather (bond) (TBEb,1)
        gs_col = idxc_ref[TBEb:TBEb + TBEs, :]                # gather (sc)

        g0 = prm_ref[0:1, :]
        be0 = prm_ref[8:9, :]
        g1 = prm_ref[16:17, :]
        be1 = prm_ref[24:25, :]
        b0 = prm_ref[32:33, :]
        b1 = prm_ref[40:41, :]
        w0t = wts_ref[0:Dp, :]                                # (Dp, Dp) bf16
        w1t = wts_ref[Dp:2 * Dp, :]

        # ---- block-wide one-hots (indices pre-offset by molecule slot) -
        G_b = onehot_lane(gb_col, TBEb, TBL)                  # gather  (TBEb, TBL)
        S_b = onehot_sub(sb_row, TBL, TBEb)                   # scatter (TBL, TBEb)
        P_a = onehot_sub(ab_row, TBEb, TBEa)                  # angles->bond
        G_s = onehot_lane(gs_col, TBEs, TBL)
        S_s = onehot_sub(ss_row, TBL, TBEs)

        def linear(v, wt, bias):                              # v: (TBL, Dp) f32
            return jnp.dot(v.astype(bf16), wt, preferred_element_type=f32) + bias

        # ---- stage 0: bond message-passing sublayer ---------------------
        xn = layernorm(x, g0, be0)
        ang_on_bond = jnp.dot(P_a, ang_x.astype(bf16), preferred_element_type=f32)
        bond_feat = (bond_x + ang_on_bond).astype(bf16)       # (TBEb, Dp)
        gathered = jnp.dot(G_b, xn.astype(bf16), preferred_element_type=f32)
        msg = gathered.astype(bf16) * bond_feat               # bf16 elementwise
        agg = jnp.dot(S_b, msg, preferred_element_type=f32)   # (TBL, Dp)
        x = x + linear(agg, w0t, b0)

        # ---- stage 1: scalar-coupling message-passing sublayer ----------
        xn2 = layernorm(x, g1, be1)
        gathered2 = jnp.dot(G_s, xn2.astype(bf16), preferred_element_type=f32)
        msg2 = gathered2.astype(bf16) * sc_x.astype(bf16)
        agg2 = jnp.dot(S_s, msg2, preferred_element_type=f32)
        out_ref[...] = (x + linear(agg2, w1t, b1)).astype(out_ref.dtype)

    return kernel


def message_passing_layer(x, bond_x, sc_pair_x, angles, mask,
                          bond_idx, sc_idx, angles_idx, params):
    """Pallas-backed forward.  `mask` unused (matches the reference forward)."""
    del mask
    B, L, D = x.shape
    Eb, Es, Ea = bond_x.shape[1], sc_pair_x.shape[1], angles.shape[1]
    assert L % 8 == 0 and Eb % 8 == 0 and Es % 8 == 0 and Ea % 8 == 0, (
        "sublane dims (L, Eb, Es, Ea) must be multiples of 8; pad inputs upstream")
    (g0, be0, g1, be1, w0, b0, w1, b1) = params
    f32, bf16, i32 = jnp.float32, jnp.bfloat16, jnp.int32

    Dp = 128 * pl.cdiv(D, 128)                        # lane-dense hidden dim

    # ---- TB (molecules per grid step) ------------------------------------
    try:
        kind = jax.devices()[0].device_kind.lower()
    except Exception:
        kind = ""
    single_tc = any(t in kind for t in ("v2", "v3", "v4", "v5", "v6"))
    per_mol_bytes = (2 * L + Eb + Es + Ea) * Dp * 4
    fixed_bytes = 48 * Dp * 4 + 2 * Dp * Dp * 2
    budget = 20 * 2 ** 20
    divisors = [d for d in range(B, 0, -1) if B % d == 0]
    fits = [d for d in divisors if 2 * d * per_mol_bytes + fixed_bytes <= budget] or [1]
    if single_tc:
        TB = fits[0]                                  # maximize TB; grid may be 1
    else:
        even = [d for d in fits if B // d >= 2]
        TB = even[0] if even else fits[0]             # keep >=2 steps for v7x megacore
    G = B // TB
    TBL, TBEb, TBEs, TBEa = TB * L, TB * Eb, TB * Es, TB * Ea
    Etot = Eb + Es + Ea

    # ---- data prep (lane padding + consolidation, all done once in XLA) --
    def pad_lane(a):
        if Dp == D:
            return a.astype(f32)
        return jnp.pad(a.astype(f32), [(0, 0)] * (a.ndim - 1) + [(0, Dp - D)])

    x2 = pad_lane(x).reshape(B * L, Dp)

    bond_p = pad_lane(bond_x).reshape(G, TBEb, Dp)
    sc_p = pad_lane(sc_pair_x).reshape(G, TBEs, Dp)
    ang_p = pad_lane(angles).reshape(G, TBEa, Dp)
    edge = jnp.concatenate([bond_p, sc_p, ang_p], axis=1).reshape(G * TB * Etot, Dp)

    # index arrays, pre-offset by the molecule slot within each grid block
    slot = (jnp.arange(B, dtype=i32) % TB)[:, None]
    sb = bond_idx[..., 0].astype(i32) + slot * L      # scatter targets (atoms)
    gb = bond_idx[..., 1].astype(i32) + slot * L      # gather sources (atoms)
    ss = sc_idx[..., 0].astype(i32) + slot * L
    gs = sc_idx[..., 1].astype(i32) + slot * L
    ab = angles_idx.astype(i32) + slot * Eb           # angle -> bond (block-local)

    W = max(TBEb, TBEs, TBEa)

    def row_slab(a, width):                           # (G, width) -> (G, 8, W)
        a = jnp.pad(a, ((0, 0), (0, W - width)))
        return jnp.concatenate([a[:, None, :], jnp.zeros((G, 7, W), i32)], axis=1)

    idx_row = jnp.concatenate(
        [row_slab(sb.reshape(G, TBEb), TBEb),
         row_slab(ss.reshape(G, TBEs), TBEs),
         row_slab(ab.reshape(G, TBEa), TBEa)], axis=1).reshape(G * 24, W)

    Hc = TBEb + TBEs
    idx_col = jnp.concatenate(
        [gb.reshape(G, TBEb), gs.reshape(G, TBEs)], axis=1).reshape(G * Hc, 1)

    # LN gamma/beta + linear biases, each on its own 8-row slab (zero lane-padding)
    def prm_slab(p):
        return jnp.concatenate([pad_lane(p), jnp.zeros((7, Dp), f32)], axis=0)

    prm = jnp.concatenate([prm_slab(g0), prm_slab(be0), prm_slab(g1),
                           prm_slab(be1), prm_slab(b0), prm_slab(b1)], axis=0)

    # MXU weights: pre-transposed, zero-padded, bf16, fused into one array
    def pad_w(w):
        return jnp.zeros((Dp, Dp), f32).at[:D, :D].set(w.T)

    wts = jnp.concatenate([pad_w(w0), pad_w(w1)], axis=0).astype(bf16)   # (2Dp, Dp)

    # ---- cost / VMEM hints ------------------------------------------------
    flops_step = 2 * Dp * (TBEb * TBEa + 2 * TBEb * TBL + 2 * TBEs * TBL + 2 * TBL * Dp)
    cost = pl.CostEstimate(
        flops=int(G * flops_step),
        transcendentals=int(2 * B * L),
        bytes_accessed=int(4 * (2 * x2.size + edge.size + idx_row.size + idx_col.size
                                + prm.size) + 2 * wts.size))
    per_step_bytes = (2 * TBL + TB * Etot) * Dp * 4 + 24 * W * 4 + Hc * 4
    vmem_limit = int(min(32 * 2 ** 20,
                         max(4 * 2 ** 20, 4 * per_step_bytes + fixed_bytes)))

    kernel = _make_kernel(TB, L, D, Dp, Eb, Es, Ea)
    out2 = pl.pallas_call(
        kernel,
        out_shape=jax.ShapeDtypeStruct((B * L, Dp), f32),
        grid_spec=pltpu.PrefetchScalarGridSpec(
            num_scalar_prefetch=0,
            grid=(G,),
            in_specs=[
                pl.BlockSpec((TBL, Dp), lambda g: (g, 0)),          # x (2D, lane-dense)
                pl.BlockSpec((TB * Etot, Dp), lambda g: (g, 0)),    # bond|sc|angle feats
                pl.BlockSpec((24, W), lambda g: (g, 0)),            # row-form indices
                pl.BlockSpec((Hc, 1), lambda g: (g, 0)),            # column-form indices
                pl.BlockSpec((48, Dp), lambda g: (0, 0)),           # LN gamma/beta + biases
                pl.BlockSpec((2 * Dp, Dp), lambda g: (0, 0)),       # W0^T | W1^T (bf16)
            ],
            out_specs=pl.BlockSpec((TBL, Dp), lambda g: (g, 0)),
        ),
        compiler_params=pltpu.CompilerParams(
            dimension_semantics=("parallel",),
            vmem_limit_bytes=vmem_limit),
        cost_estimate=cost,
    )(x2, edge, idx_row, idx_col, prm, wts)

    return out2[:, :D].reshape(B, L, D)


def reference_forward(x, bond_x, sc_pair_x, angles,
                      bond_idx, sc_idx, angles_idx, params):
    """Pure-JAX reference of the same math, mirroring the kernel's bf16 roundings
    (bf16 MXU operands with f32 accumulation, bf16 elementwise message products)."""
    B, L, D = x.shape
    Eb = bond_x.shape[1]
    (g0, be0, g1, be1, w0, b0, w1, b1) = params
    f32 = jnp.float32
    bf = lambda a: a.astype(jnp.bfloat16).astype(f32)

    def ln(v, gamma, beta):
        mu = jnp.mean(v, axis=-1, keepdims=True)
        var = jnp.mean((v - mu) ** 2, axis=-1, keepdims=True)
        return (v - mu) * jax.lax.rsqrt(var + LN_EPS) * gamma + beta

    S_b = jax.nn.one_hot(bond_idx[..., 0], L, dtype=f32).transpose(0, 2, 1)
    G_b = jax.nn.one_hot(bond_idx[..., 1], L, dtype=f32)
    P_a = jax.nn.one_hot(angles_idx, Eb, dtype=f32).transpose(0, 2, 1)
    S_s = jax.nn.one_hot(sc_idx[..., 0], L, dtype=f32).transpose(0, 2, 1)
    G_s = jax.nn.one_hot(sc_idx[..., 1], L, dtype=f32)

    xn = ln(x, g0, be0)
    bond_feat = bf(bond_x + jnp.einsum("bea,bad->bed", P_a, bf(angles)))
    gathered = jnp.einsum("bel,bld->bed", G_b, bf(xn))
    msg = bf(bf(gathered) * bond_feat)
    agg = jnp.einsum("ble,bed->bld", S_b, msg)
    x = x + jnp.einsum("bld,dk->blk", bf(agg), bf(w0.T)) + b0

    xn2 = ln(x, g1, be1)
    gathered2 = jnp.einsum("bel,bld->bed", G_s, bf(xn2))
    msg2 = bf(bf(gathered2) * bf(sc_pair_x))
    agg2 = jnp.einsum("ble,bed->bld", S_s, msg2)
    return x + jnp.einsum("bld,dk->blk", bf(agg2), bf(w1.T)) + b1


def init_params(key, size):
    """Deterministic init matching the module's __init__ (N=1, t=0)."""
    ks = jax.random.split(key, 6)
    bound = 1.0 / np.sqrt(size)
    # LayerNorm (custom reset): weight ~ U(0,1), bias = 0
    g0 = jax.random.uniform(ks[0], (1, size), jnp.float32)
    be0 = jnp.zeros((1, size), jnp.float32)
    g1 = jax.random.uniform(ks[1], (1, size), jnp.float32)
    be1 = jnp.zeros((1, size), jnp.float32)
    # nn.Linear(size, size): W (size,size), b (size,), U(-1/sqrt, 1/sqrt)
    w0 = jax.random.uniform(ks[2], (size, size), jnp.float32, -bound, bound)
    b0 = jax.random.uniform(ks[3], (1, size), jnp.float32, -bound, bound)
    w1 = jax.random.uniform(ks[4], (size, size), jnp.float32, -bound, bound)
    b1 = jax.random.uniform(ks[5], (1, size), jnp.float32, -bound, bound)
    return (g0, be0, g1, be1, w0, b0, w1, b1)


if __name__ == "__main__":
    B, L, D = 4, 8, 32          # batch, atoms, hidden size
    Eb, Es, Ea = 16, 16, 16     # bonds, scalar-coupling pairs, angles

    key = jax.random.PRNGKey(0)
    kx, kb, ks, ka, ki1, ki2, ki3, kp = jax.random.split(key, 8)

    x = jax.random.normal(kx, (B, L, D), jnp.float32)
    bond_x = jax.random.normal(kb, (B, Eb, D), jnp.float32)
    sc_pair_x = jax.random.normal(ks, (B, Es, D), jnp.float32)
    angles = jax.random.normal(ka, (B, Ea, D), jnp.float32)
    mask = jnp.ones((B, L), jnp.float32)   # unused by forward, kept for signature
    bond_idx = jax.random.randint(ki1, (B, Eb, 2), 0, L)
    sc_idx = jax.random.randint(ki2, (B, Es, 2), 0, L)
    angles_idx = jax.random.randint(ki3, (B, Ea), 0, Eb)

    params = init_params(kp, D)

    out = message_passing_layer(x, bond_x, sc_pair_x, angles, mask,
                                bond_idx, sc_idx, angles_idx, params)
    out = jax.block_until_ready(out)

    ref = reference_forward(x, bond_x, sc_pair_x, angles,
                            bond_idx, sc_idx, angles_idx, params)
    np.testing.assert_allclose(np.asarray(out), np.asarray(ref),
                               rtol=2e-3, atol=2e-3)
    print("KERNEL_OK")
</pallas_src>

<mosaic_0001>
module attributes {stable_mosaic.version = 11 : i64} {
  func.func @kernel(%arg0: i32, %arg1: memref<16x128xf32, #tpu.memory_space<vmem>>, %arg2: memref<96x128xf32, #tpu.memory_space<vmem>>, %arg3: memref<24x32xi32, #tpu.memory_space<vmem>>, %arg4: memref<64x1xi32, #tpu.memory_space<vmem>>, %arg5: memref<48x128xf32, #tpu.memory_space<vmem>>, %arg6: memref<256x128xbf16, #tpu.memory_space<vmem>>, %arg7: memref<16x128xf32, #tpu.memory_space<vmem>>) attributes {dimension_semantics = [#tpu.dimension_semantics<parallel>], iteration_bounds = array<i64: 2>, scalar_prefetch = 0 : i64, scratch_operands = 0 : i64, tpu.core_type = #tpu.core_type<tc>, window_params = [{transform_indices = @transform_0, window_bounds = array<i64: 16, 128>}, {transform_indices = @transform_1, window_bounds = array<i64: 96, 128>}, {transform_indices = @transform_2, window_bounds = array<i64: 24, 32>}, {transform_indices = @transform_3, window_bounds = array<i64: 64, 1>}, {pipeline_mode = #tpu.pipeline_mode<synchronous>, transform_indices = @transform_4, window_bounds = array<i64: 48, 128>}, {pipeline_mode = #tpu.pipeline_mode<synchronous>, transform_indices = @transform_5, window_bounds = array<i64: 256, 128>}, {transform_indices = @transform_6, window_bounds = array<i64: 16, 128>}]} {
    %c0 = arith.constant 0 : index
    %c0_0 = arith.constant 0 : index
    %0 = vector.load %arg1[%c0, %c0_0] : memref<16x128xf32, #tpu.memory_space<vmem>>, vector<16x128xf32>
    %c0_1 = arith.constant 0 : index
    %c0_2 = arith.constant 0 : index
    %1 = vector.load %arg2[%c0_1, %c0_2] : memref<96x128xf32, #tpu.memory_space<vmem>>, vector<32x128xf32>
    %c32 = arith.constant 32 : index
    %c0_3 = arith.constant 0 : index
    %2 = vector.load %arg2[%c32, %c0_3] : memref<96x128xf32, #tpu.memory_space<vmem>>, vector<32x128xf32>
    %c64 = arith.constant 64 : index
    %c0_4 = arith.constant 0 : index
    %3 = vector.load %arg2[%c64, %c0_4] : memref<96x128xf32, #tpu.memory_space<vmem>>, vector<32x128xf32>
    %c0_5 = arith.constant 0 : index
    %c0_6 = arith.constant 0 : index
    %4 = vector.load %arg3[%c0_5, %c0_6] : memref<24x32xi32, #tpu.memory_space<vmem>>, vector<1x32xi32>
    %c8 = arith.constant 8 : index
    %c0_7 = arith.constant 0 : index
    %5 = vector.load %arg3[%c8, %c0_7] : memref<24x32xi32, #tpu.memory_space<vmem>>, vector<1x32xi32>
    %c16 = arith.constant 16 : index
    %c0_8 = arith.constant 0 : index
    %6 = vector.load %arg3[%c16, %c0_8] : memref<24x32xi32, #tpu.memory_space<vmem>>, vector<1x32xi32>
    %c0_9 = arith.constant 0 : index
    %c0_10 = arith.constant 0 : index
    %7 = vector.load %arg4[%c0_9, %c0_10] : memref<64x1xi32, #tpu.memory_space<vmem>>, vector<32x1xi32>
    %c32_11 = arith.constant 32 : index
    %c0_12 = arith.constant 0 : index
    %8 = vector.load %arg4[%c32_11, %c0_12] : memref<64x1xi32, #tpu.memory_space<vmem>>, vector<32x1xi32>
    %c0_13 = arith.constant 0 : index
    %c0_14 = arith.constant 0 : index
    %9 = vector.load %arg5[%c0_13, %c0_14] : memref<48x128xf32, #tpu.memory_space<vmem>>, vector<1x128xf32>
    %c8_15 = arith.constant 8 : index
    %c0_16 = arith.constant 0 : index
    %10 = vector.load %arg5[%c8_15, %c0_16] : memref<48x128xf32, #tpu.memory_space<vmem>>, vector<1x128xf32>
    %c16_17 = arith.constant 16 : index
    %c0_18 = arith.constant 0 : index
    %11 = vector.load %arg5[%c16_17, %c0_18] : memref<48x128xf32, #tpu.memory_space<vmem>>, vector<1x128xf32>
    %c24 = arith.constant 24 : index
    %c0_19 = arith.constant 0 : index
    %12 = vector.load %arg5[%c24, %c0_19] : memref<48x128xf32, #tpu.memory_space<vmem>>, vector<1x128xf32>
    %c32_20 = arith.constant 32 : index
    %c0_21 = arith.constant 0 : index
    %13 = vector.load %arg5[%c32_20, %c0_21] : memref<48x128xf32, #tpu.memory_space<vmem>>, vector<1x128xf32>
    %c40 = arith.constant 40 : index
    %c0_22 = arith.constant 0 : index
    %14 = vector.load %arg5[%c40, %c0_22] : memref<48x128xf32, #tpu.memory_space<vmem>>, vector<1x128xf32>
    %c0_23 = arith.constant 0 : index
    %c0_24 = arith.constant 0 : index
    %15 = vector.load %arg6[%c0_23, %c0_24] : memref<256x128xbf16, #tpu.memory_space<vmem>>, vector<128x128xbf16>
    %c128 = arith.constant 128 : index
    %c0_25 = arith.constant 0 : index
    %16 = vector.load %arg6[%c128, %c0_25] : memref<256x128xbf16, #tpu.memory_space<vmem>>, vector<128x128xbf16>
    %17 = tpu.iota {dimensions = array<i32: 1>} : vector<32x16xi32>
    %18 = vector.broadcast %7 : vector<32x1xi32> to vector<32x16xi32>
    %19 = arith.cmpi eq, %17, %18 : vector<32x16xi32>
    %20 = arith.extui %19 : vector<32x16xi1> to vector<32x16xi32>
    %21 = arith.sitofp %20 : vector<32x16xi32> to vector<32x16xf32>
    %22 = arith.truncf %21 : vector<32x16xf32> to vector<32x16xbf16>
    %23 = tpu.iota {dimensions = array<i32: 0>} : vector<16x32xi32>
    %24 = vector.broadcast %4 : vector<1x32xi32> to vector<16x32xi32>
    %25 = arith.cmpi eq, %23, %24 : vector<16x32xi32>
    %26 = arith.extui %25 : vector<16x32xi1> to vector<16x32xi32>
    %27 = arith.sitofp %26 : vector<16x32xi32> to vector<16x32xf32>
    %28 = arith.truncf %27 : vector<16x32xf32> to vector<16x32xbf16>
    %29 = tpu.iota {dimensions = array<i32: 0>} : vector<32x32xi32>
    %30 = vector.broadcast %6 : vector<1x32xi32> to vector<32x32xi32>
    %31 = arith.cmpi eq, %29, %30 : vector<32x32xi32>
    %32 = arith.extui %31 : vector<32x32xi1> to vector<32x32xi32>
    %33 = arith.sitofp %32 : vector<32x32xi32> to vector<32x32xf32>
    %34 = arith.truncf %33 : vector<32x32xf32> to vector<32x32xbf16>
    %35 = tpu.iota {dimensions = array<i32: 1>} : vector<32x16xi32>
    %36 = vector.broadcast %8 : vector<32x1xi32> to vector<32x16xi32>
    %37 = arith.cmpi eq, %35, %36 : vector<32x16xi32>
    %38 = arith.extui %37 : vector<32x16xi1> to vector<32x16xi32>
    %39 = arith.sitofp %38 : vector<32x16xi32> to vector<32x16xf32>
    %40 = arith.truncf %39 : vector<32x16xf32> to vector<32x16xbf16>
    %41 = tpu.iota {dimensions = array<i32: 0>} : vector<16x32xi32>
    %42 = vector.broadcast %5 : vector<1x32xi32> to vector<16x32xi32>
    %43 = arith.cmpi eq, %41, %42 : vector<16x32xi32>
    %44 = arith.extui %43 : vector<16x32xi1> to vector<16x32xi32>
    %45 = arith.sitofp %44 : vector<16x32xi32> to vector<16x32xf32>
    %46 = arith.truncf %45 : vector<16x32xf32> to vector<16x32xbf16>
    %cst = arith.constant dense<0.000000e+00> : vector<16xf32>
    %47 = vector.multi_reduction <add>, %0, %cst [1] : vector<16x128xf32> to vector<16xf32>
    %48 = vector.shape_cast %47 : vector<16xf32> to vector<16x1xf32>
    %cst_26 = arith.constant 3.125000e-02 : f32
    %49 = vector.broadcast %cst_26 : f32 to vector<16x1xf32>
    %50 = arith.mulf %48, %49 : vector<16x1xf32>
    %51 = arith.mulf %0, %0 : vector<16x128xf32>
    %cst_27 = arith.constant dense<0.000000e+00> : vector<16xf32>
    %52 = vector.multi_reduction <add>, %51, %cst_27 [1] : vector<16x128xf32> to vector<16xf32>
    %53 = vector.shape_cast %52 : vector<16xf32> to vector<16x1xf32>
    %cst_28 = arith.constant 3.125000e-02 : f32
    %54 = vector.broadcast %cst_28 : f32 to vector<16x1xf32>
    %55 = arith.mulf %53, %54 : vector<16x1xf32>
    %56 = arith.mulf %50, %50 : vector<16x1xf32>
    %57 = arith.subf %55, %56 : vector<16x1xf32>
    %cst_29 = arith.constant 9.99999974E-6 : f32
    %58 = vector.broadcast %cst_29 : f32 to vector<16x1xf32>
    %59 = arith.addf %57, %58 : vector<16x1xf32>
    %60 = math.rsqrt %59 : vector<16x1xf32>
    %61 = vector.broadcast %50 : vector<16x1xf32> to vector<16x128xf32>
    %62 = arith.subf %0, %61 : vector<16x128xf32>
    %63 = vector.broadcast %60 : vector<16x1xf32> to vector<16x128xf32>
    %64 = arith.mulf %62, %63 : vector<16x128xf32>
    %65 = vector.broadcast %9 : vector<1x128xf32> to vector<16x128xf32>
    %66 = arith.mulf %64, %65 : vector<16x128xf32>
    %67 = vector.broadcast %10 : vector<1x128xf32> to vector<16x128xf32>
    %68 = arith.addf %66, %67 : vector<16x128xf32>
    %69 = arith.truncf %3 : vector<32x128xf32> to vector<32x128xbf16>
    %cst_30 = arith.constant dense<0.000000e+00> : vector<32x128xf32>
    %70 = tpu.matmul %34, %69, %cst_30 {dimension_numbers = #tpu.dot_dimension_numbers<[1], [0], [0], [1], [0, 0, 1, 1], [], []>} : vector<32x32xbf16>, vector<32x128xbf16>, vector<32x128xf32> -> vector<32x128xf32>
    %71 = arith.addf %1, %70 : vector<32x128xf32>
    %72 = arith.truncf %71 : vector<32x128xf32> to vector<32x128xbf16>
    %73 = arith.truncf %68 : vector<16x128xf32> to vector<16x128xbf16>
    %cst_31 = arith.constant dense<0.000000e+00> : vector<32x128xf32>
    %74 = tpu.matmul %22, %73, %cst_31 {dimension_numbers = #tpu.dot_dimension_numbers<[1], [0], [0], [1], [0, 0, 1, 1], [], []>} : vector<32x16xbf16>, vector<16x128xbf16>, vector<32x128xf32> -> vector<32x128xf32>
    %75 = arith.truncf %74 : vector<32x128xf32> to vector<32x128xbf16>
    %76 = arith.mulf %75, %72 : vector<32x128xbf16>
    %cst_32 = arith.constant dense<0.000000e+00> : vector<16x128xf32>
    %77 = tpu.matmul %28, %76, %cst_32 {dimension_numbers = #tpu.dot_dimension_numbers<[1], [0], [0], [1], [0, 0, 1, 1], [], []>} : vector<16x32xbf16>, vector<32x128xbf16>, vector<16x128xf32> -> vector<16x128xf32>
    %78 = arith.truncf %77 : vector<16x128xf32> to vector<16x128xbf16>
    %cst_33 = arith.constant dense<0.000000e+00> : vector<16x128xf32>
    %79 = tpu.matmul %78, %15, %cst_33 {dimension_numbers = #tpu.dot_dimension_numbers<[1], [0], [0], [1], [0, 0, 1, 1], [], []>} : vector<16x128xbf16>, vector<128x128xbf16>, vector<16x128xf32> -> vector<16x128xf32>
    %80 = vector.broadcast %13 : vector<1x128xf32> to vector<16x128xf32>
    %81 = arith.addf %79, %80 : vector<16x128xf32>
    %82 = arith.addf %0, %81 : vector<16x128xf32>
    %cst_34 = arith.constant dense<0.000000e+00> : vector<16xf32>
    %83 = vector.multi_reduction <add>, %82, %cst_34 [1] : vector<16x128xf32> to vector<16xf32>
    %84 = vector.shape_cast %83 : vector<16xf32> to vector<16x1xf32>
    %cst_35 = arith.constant 3.125000e-02 : f32
    %85 = vector.broadcast %cst_35 : f32 to vector<16x1xf32>
    %86 = arith.mulf %84, %85 : vector<16x1xf32>
    %87 = arith.mulf %82, %82 : vector<16x128xf32>
    %cst_36 = arith.constant dense<0.000000e+00> : vector<16xf32>
    %88 = vector.multi_reduction <add>, %87, %cst_36 [1] : vector<16x128xf32> to vector<16xf32>
    %89 = vector.shape_cast %88 : vector<16xf32> to vector<16x1xf32>
    %cst_37 = arith.constant 3.125000e-02 : f32
    %90 = vector.broadcast %cst_37 : f32 to vector<16x1xf32>
    %91 = arith.mulf %89, %90 : vector<16x1xf32>
    %92 = arith.mulf %86, %86 : vector<16x1xf32>
    %93 = arith.subf %91, %92 : vector<16x1xf32>
    %cst_38 = arith.constant 9.99999974E-6 : f32
    %94 = vector.broadcast %cst_38 : f32 to vector<16x1xf32>
    %95 = arith.addf %93, %94 : vector<16x1xf32>
    %96 = math.rsqrt %95 : vector<16x1xf32>
    %97 = vector.broadcast %86 : vector<16x1xf32> to vector<16x128xf32>
    %98 = arith.subf %82, %97 : vector<16x128xf32>
    %99 = vector.broadcast %96 : vector<16x1xf32> to vector<16x128xf32>
    %100 = arith.mulf %98, %99 : vector<16x128xf32>
    %101 = vector.broadcast %11 : vector<1x128xf32> to vector<16x128xf32>
    %102 = arith.mulf %100, %101 : vector<16x128xf32>
    %103 = vector.broadcast %12 : vector<1x128xf32> to vector<16x128xf32>
    %104 = arith.addf %102, %103 : vector<16x128xf32>
    %105 = arith.truncf %104 : vector<16x128xf32> to vector<16x128xbf16>
    %cst_39 = arith.constant dense<0.000000e+00> : vector<32x128xf32>
    %106 = tpu.matmul %40, %105, %cst_39 {dimension_numbers = #tpu.dot_dimension_numbers<[1], [0], [0], [1], [0, 0, 1, 1], [], []>} : vector<32x16xbf16>, vector<16x128xbf16>, vector<32x128xf32> -> vector<32x128xf32>
    %107 = arith.truncf %106 : vector<32x128xf32> to vector<32x128xbf16>
    %108 = arith.truncf %2 : vector<32x128xf32> to vector<32x128xbf16>
    %109 = arith.mulf %107, %108 : vector<32x128xbf16>
    %cst_40 = arith.constant dense<0.000000e+00> : vector<16x128xf32>
    %110 = tpu.matmul %46, %109, %cst_40 {dimension_numbers = #tpu.dot_dimension_numbers<[1], [0], [0], [1], [0, 0, 1, 1], [], []>} : vector<16x32xbf16>, vector<32x128xbf16>, vector<16x128xf32> -> vector<16x128xf32>
    %111 = arith.truncf %110 : vector<16x128xf32> to vector<16x128xbf16>
    %cst_41 = arith.constant dense<0.000000e+00> : vector<16x128xf32>
    %112 = tpu.matmul %111, %16, %cst_41 {dimension_numbers = #tpu.dot_dimension_numbers<[1], [0], [0], [1], [0, 0, 1, 1], [], []>} : vector<16x128xbf16>, vector<128x128xbf16>, vector<16x128xf32> -> vector<16x128xf32>
    %113 = vector.broadcast %14 : vector<1x128xf32> to vector<16x128xf32>
    %114 = arith.addf %112, %113 : vector<16x128xf32>
    %115 = arith.addf %82, %114 : vector<16x128xf32>
    %c0_42 = arith.constant 0 : index
    %c0_43 = arith.constant 0 : index
    %116 = vector.load %arg7[%c0_42, %c0_43] : memref<16x128xf32, #tpu.memory_space<vmem>>, vector<16x128xf32>
    tpu.vector_store %arg7[%c0_42, %c0_43], %115 {strides = array<i32>} : memref<16x128xf32, #tpu.memory_space<vmem>>, vector<16x128xf32>,
    return
  }
  func.func @transform_0(%arg0: i32) -> (i32, i32) {
    %c0_i32 = arith.constant 0 : i32
    %c0_i32_0 = arith.constant 0 : i32
    return %arg0, %c0_i32 : i32, i32
  }
  func.func @transform_1(%arg0: i32) -> (i32, i32) {
    %c0_i32 = arith.constant 0 : i32
    %c0_i32_0 = arith.constant 0 : i32
    return %arg0, %c0_i32 : i32, i32
  }
  func.func @transform_2(%arg0: i32) -> (i32, i32) {
    %c0_i32 = arith.constant 0 : i32
    %c0_i32_0 = arith.constant 0 : i32
    return %arg0, %c0_i32 : i32, i32
  }
  func.func @transform_3(%arg0: i32) -> (i32, i32) {
    %c0_i32 = arith.constant 0 : i32
    %c0_i32_0 = arith.constant 0 : i32
    return %arg0, %c0_i32 : i32, i32
  }
  func.func @transform_4(%arg0: i32) -> (i32, i32) {
    %c0_i32 = arith.constant 0 : i32
    %c0_i32_0 = arith.constant 0 : i32
    %c0_i32_1 = arith.constant 0 : i32
    return %c0_i32, %c0_i32_0 : i32, i32
  }
  func.func @transform_5(%arg0: i32) -> (i32, i32) {
    %c0_i32 = arith.constant 0 : i32
    %c0_i32_0 = arith.constant 0 : i32
    %c0_i32_1 = arith.constant 0 : i32
    return %c0_i32, %c0_i32_0 : i32, i32
  }
  func.func @transform_6(%arg0: i32) -> (i32, i32) {
    %c0_i32 = arith.constant 0 : i32
    %c0_i32_0 = arith.constant 0 : i32
    return %arg0, %c0_i32 : i32, i32
  }
}

</mosaic_0001>

<bundles_post_ra>
// kernel: tpu_custom_call.1
= control target key start
LH: loop header
LB: loop body
LE: loop exit
PB: predicated region body
PF: predicated region fallthrough
CT: control target
= control target key end

     0   :  { %11 = vsyncpa [#allocation3], 0  ;;  %s2057_s0 = inlined_call_operand.hbm [shape: f32[32,128], index: 0, kind: input, shape index: {}]   ;;  %s2058_s1 = inlined_call_operand.vmem [shape: f32[192,128], index: 1, kind: input, shape index: {}]   ;;  %s2059_s2 = inlined_call_operand.vmem [shape: s32[48,32], index: 2, kind: input, shape index: {}]   ;;  %s2060_s3 = inlined_call_operand.vmem [shape: s32[128,1], index: 3, kind: input, shape index: {}]   ;;  %s2061_s4 = inlined_call_operand.hbm [shape: f32[48,128], index: 4, kind: input, shape index: {}]   ;;  %s2062_s5 = inlined_call_operand.hbm [shape: bf16[256,128], index: 5, kind: input, shape index: {}]   ;;  %s2063_s6 = inlined_call_operand.hbm [shape: f32[32,128], index: 6, kind: output, shape index: {}]  }
   0x1   :  { %13 = vsyncpa [#allocation3 + $0x1], 0 }
   0x2   :  { %14 = vsyncpa [#allocation6], 0 }
   0x3   :  { %15 = vsyncpa [#allocation4], 0 }
   0x4   :  { %17 = vsyncpa [#allocation4 + $0x1], 0  ;;  %s1700_s21 = smov 0   ;;  %s1702_s22 = smov 0  }
   0x5   :  { %s1704_s23 = smov 0   ;;  %s1706_s24 = smov 0  }
   0x6 LB: > { %s1721_s25 = sadd.s32 4294967295, %s1650_s24   ;;  %s1217_s26 = sadd.s32 4294967294, %s1650_s24   ;;  %s1650_s24 = sphi %s1706_s24, %s2088_s24   ;;  %s1646_s23 = sphi %s1704_s23, %s2087_s23   ;;  %s1642_s22 = sphi %s1702_s22, %s2086_s22   ;;  %s1638_s21 = sphi %s1700_s21, %s2085_s21  }
   0x7   : > { %p43_p0 = scmp.ne.s32.totalorder %s1642_s22, %s1638_s21  ;;  %p2064_p1 = scmp.eq.s32.totalorder %s1721_s25, 0 }
   0x8   : > { %p187_p2 = scmp.eq.s32.totalorder %s1721_s25, 1  ;;  %p193_p3 = scmp.eq.s32.totalorder %s1217_s26, 1 }
   0x9   : > { %p1730_p4 = por %p2064_p1, %p43_p0  ;;  %p1218_p5 = scmp.ge.s32.totalorder %s1650_s24, 1 }
   0xa   : > { %p1735_p6 = por %p193_p3, %p43_p0  ;;  %p200_p7 = scmp.lt.s32.totalorder %s1650_s24, 3 }
   0xb   : > { %s2070_s27 = scalar_select %p1730_p4, 1, 0 }
   0xc   : > { %s2071_s28 = scalar_select %p1735_p6, 1, 0 }
   0xd   : > { %p1740_p8 = pnand %p1218_p5, %p200_p7  ;;  %s1652_s30 = smov [#allocation5]  }
   0xe   : > { %s212_s7 = sshll.u32 %s1652_s30, 4  ;;  %s1653_s9 = smov [#allocation7]   ;;  %s213_s7 = int_to_ptr.vmem [resolvable:$true] %s212_s7 }
   0xf   : > { %s2072_s29 = scalar_select %p1740_p8, 1, 0 }
  0x10   : > { %p1412_p9 = pneg %p1740_p8  ;;  %s225_s10 = sshll.u32 %s1653_s9, 4  ;;  %s226_s10 = int_to_ptr.vmem [resolvable:$true] %s225_s10 }
  0x11   : > { %s1513_s11 = scalar_lea.vmem %s213_s7, 768  ;;  %p1521_p5 = scmp.lt.s32.totalorder %s213_s7, %s213_s7 }
  0x12   : > { %p1749_p11 = pnand %p1412_p9, %p2064_p1  ;;  %p1514_p13 = scmp.ne.s32.totalorder %s213_s7, %s1513_s11 }
  0x13   : > { %p1522_p7 = scmp.lt.s32.totalorder %s1513_s11, %s1513_s11 }
  0x14   : > { %p1504_p12 = pneg %p1749_p11 }
  0x15   : > { %p1523_p10 = por %p1522_p7, %p1521_p5 }
  0x16   : > { %p1516_p0 = pnand %p1514_p13, %p1504_p12 }
  0x18   : > { %p1517_p3 = pneg %p1516_p0 }
  0x1a   : > { %p1524_p9 = pnand %p1523_p10, %p1517_p3 }
  0x1c   : > { %1527 = shalt.err (!%p1524_p9)
}
  0x1d   : > { %s2065_s12 = smov 128   ;;  %s2066_s13 = smov 8  }
  0x1e   : > { %1415 = dma.hbm_to_vmem [thread:$0]  (!%p1749_p11), %s2061_s4, 768, %s213_s7, [#allocation6], %s2065_s12, %s2065_s12, %s2066_s13  }
  0x1f   : > { %s1539_s16 = scalar_lea.vmem %s226_s10, 2048  ;;  %p1547_p10 = scmp.lt.s32.totalorder %s226_s10, %s226_s10 }
  0x20   : > { %p1540_p13 = scmp.ne.s32.totalorder %s226_s10, %s1539_s16  ;;  %p1548_p3 = scmp.lt.s32.totalorder %s1539_s16, %s1539_s16 }
  0x22   : > { %p1542_p0 = pnand %p1540_p13, %p1504_p12  ;;  %p1549_p7 = por %p1548_p3, %p1547_p10 }
  0x24   : > { %p1543_p5 = pneg %p1542_p0 }
  0x26   : > { %p1550_p9 = pnand %p1549_p7, %p1543_p5 }
  0x28   : > { %1553 = shalt.err (!%p1550_p9)
}
  0x29   : > { %s1656_s17 = smov 64   ;;  %s1657_s18 = smov 4  }
  0x2a   : > { %1418 = dma.hbm_to_vmem [thread:$0]  (!%p1749_p11), %s2062_s5, 2048, %s226_s10, [#allocation6], %s1656_s17, %s1656_s17, %s1657_s18  }
  0x2b   : > { %s1775_s26 = sadd.s32 1, %s1650_s24   ;;  %s30_s7 = sadd.s32 1, %s1646_s23 }
  0x2c   : > { %s27_s30 = ssub.s32 %s1650_s24, %s1775_s26  ;;  %p37_p13 = scmp.ne.s32.totalorder %s1646_s23, %s1642_s22 }
  0x2d   : > { %p28_p12 = scmp.eq.s32.totalorder %s27_s30, 0  ;;  %p38_p0 = scmp.eq.s32.totalorder %s1650_s24, 0 }
  0x2e   : > { %p1788_p10 = por %p187_p2, %p37_p13  ;;  %p1429_p3 = scmp.lt.s32.totalorder %s1650_s24, 2 }
  0x2f   : > { %s1784_s9 = scalar_select %p28_p12, %s1646_s23, %s30_s7  }
  0x30   : > { %p39_p5 = por %p38_p0, %p37_p13  ;;  %s239_s8 = sand.u32 1, %s1646_s23  }
  0x31   : > { %s2074_s11 = scalar_select %p1788_p10, 1, 0 }
  0x32   : > { %s1222_s14 = sshll.u32 %s239_s8, 4  ;;  %s1288_s10 = sshll.u32 %s1650_s24, 8 }
  0x33   : > { %s1798_s17 = scalar_lea.hbm %s2057_s0, %s1288_s10  ;;  %s243_s18 = scalar_lea.vmem [#allocation2], %s1222_s14 }
  0x34   : > { %s250_s19 = sshll.u32 %s243_s18, 4  ;;  %p1802_p2 = pnand %p1429_p3, %p39_p5  ;;  %s1800_s19 = int_to_ptr.vmem [resolvable:$true] %s250_s19 }
  0x35   : > { %s1806_s30 = scalar_lea.sflag [#allocation3], %s239_s8  ;;  %s1554_s7 = scalar_lea.hbm %s1798_s17, 256 }
  0x36   : > { %p1555_p11 = scmp.ne.s32.totalorder %s1798_s17, %s1554_s7  ;;  %p1556_p7 = pneg %p1802_p2 }
  0x37   : > { %s1559_s14 = scalar_lea.hbm %s2057_s0, 512  ;;  %p1560_p13 = scmp.lt.s32.totalorder %s1798_s17, %s2057_s0 }
  0x38   : > { %p1557_p9 = pnand %p1556_p7, %p1555_p11  ;;  %p1561_p0 = scmp.lt.s32.totalorder %s1559_s14, %s1554_s7 }
  0x3a   : > { %p1558_p12 = pneg %p1557_p9  ;;  %p1562_p5 = por %p1561_p0, %p1560_p13 }
  0x3c   : > { %p1563_p3 = pnand %p1562_p5, %p1558_p12 }
  0x3e   : > { %1566 = shalt.err (!%p1563_p3)
}
  0x3f   : > { %s1567_s8 = scalar_lea.vmem %s1800_s19, 256  ;;  %s1658_s12 = smov [#allocation2]  }
  0x40   : > { %p1568_p1 = scmp.ne.s32.totalorder %s1800_s19, %s1567_s8  ;;  %s1572_s13 = sshll.u32 %s1658_s12, 4  ;;  %s1573_s13 = int_to_ptr.vmem [resolvable:$false] %s1572_s13 }
  0x41   : > { %s1574_s10 = scalar_lea.vmem %s1573_s13, 512  ;;  %p1575_p9 = scmp.lt.s32.totalorder %s1800_s19, %s1573_s13 }
  0x42   : > { %p1570_p6 = pnand %p1568_p1, %p1556_p7  ;;  %p1576_p10 = scmp.lt.s32.totalorder %s1574_s10, %s1567_s8 }
  0x44   : > { %p1571_p11 = pneg %p1570_p6  ;;  %p1577_p4 = por %p1576_p10, %p1575_p9 }
  0x46   : > { %p1578_p8 = pnand %p1577_p4, %p1571_p11 }
  0x48   : > { %1581 = shalt.err (!%p1578_p8)
}
  0x49   : > { %s2076_s7 = smov 8   ;;  %s2077_s15 = smov 128  }
  0x4a   : > { %1422 = dma.hbm_to_vmem [thread:$0]  (!%p1802_p2), %s1798_s17, 256, %s1800_s19, %s1806_s30, %s2077_s15, %s2077_s15, %s2076_s7  }
  0x4b   : > { %p2078_p1 = scmp.ne.s32.totalorder %s2072_s29, 0 }
  0x4c   : > { %s1833_s12 = sand.u32 (!%p2078_p1), 1, %s1642_s22   ;;  %p2079_p4 = scmp.ne.s32.totalorder (!%p2078_p1), %s2070_s27, 0 }
  0x4d   : > { %289 = sbr.rel (%p2078_p1) target bundleno = 1721 (0x6b9), region = 44  ;;  %s1226_s13 = sshll.u32 (!%p2078_p1), %s1833_s12, 4 }
  0x4e   : > { %s292_s14 = scalar_lea.sflag (!%p2078_p1), [#allocation3], %s1833_s12  ;;  %s295_s20 = scalar_lea.vmem (!%p2078_p1), [#allocation2], %s1226_s13 }
  0x52   : > { %1625 = dma.done.wait (%p2079_p4), %s292_s14, 256  }
  0x53   : > { %1627 = vsyncadd (%p2079_p4), %s292_s14, 4294967040  ;;  %p2080_p6 = scmp.eq.s32.totalorder %s1721_s25, 0 }
  0x55   : > { %1629 = dma.done.wait (%p2080_p6), [#allocation6], 2816   ;;  %p2081_p8 = pmov %p2080_p6 }
  0x56   : > { %v1659_v0 = vmov 0   ;;  %s1232_s29 = sshll.u32 %s1721_s25, 3  ;;  %v1848_v1 = vld [vmem:[%s295_s20] sm:$0xff]  ;;  %v1850_v2 = vld [vmem:[%s295_s20 + $0x8] sm:$0xff]  ;;  %s348_s16 = smul.u32 12, %s1721_s25  ;;  %v431_v8 = vlaneseq  ;;  %vm570_vm0 = vcmask 261120  }
  0x57   : > { %1631 = vsyncadd (%p2081_p8), [#allocation6], 4294964480  ;;  %1477 = vset.pattern.permute.xlu1 %v1659_v0  ;;  %1476 = vset.pattern.permute.xlu0 %v1659_v0  ;;  %p361_p10 = scmp.lt.s32.totalorder %s1232_s29, 15  ;;  %v536_v3 = vmul.f32 %v1848_v1, %v1848_v1  ;;  %v537_v4 = vmul.f32 %v1850_v2, %v1850_v2  ;;  %s354_s18 = smul.u32 3, %s1721_s25  ;;  %v1660_v23 = vmov 0.0   ;;  %vm633_vm11 = vcmask 130048  }
  0x58   : > { %530 = vadd.xlane.f32.xlu0 %v1848_v1  ;;  %p349_p2 = scmp.lt.s32.totalorder %s348_s16, 23  ;;  %v1878_v15 = vshrl.u32 %v431_v8, 7  ;;  %v1909_v42 = vand.u32 127, %v431_v8  ;;  %v1253_v54 = vld [vmem:[#allocation5] ss:$0 sm:$0xff]  ;;  %vm1661_vm14 = vmmov 0  }
  0x59   : > { %s2090_s29 = smov (!%p361_p10, %s1232_s29), 15  ;;  %538 = vadd.xlane.f32.xlu1 %v536_v3  ;;  %p355_p7 = scmp.lt.s32.totalorder %s354_s18, 5  ;;  %v1254_v60 = vld [vmem:[#allocation5 + $0x8] ss:$0 sm:$0xff] }
  0x5a   : > { %s1233_s27 = sshll.u32 %s2090_s29, 3  ;;  %s2092_s16 = smov (!%p349_p2, %s348_s16), 23  ;;  %v1881_v17 = vadd.s32 8, %v1878_v15  ;;  %v473_v18 = vadd.s32 16, %v1878_v15  ;;  %v474_v19 = vadd.s32 24, %v1878_v15 }
  0x5b   : > { %s1861_s30 = scalar_lea.vmem %s2060_s3, %s1233_s27  ;;  %s1230_s8 = sshll.u32 %s2092_s16, 3 }
  0x5c   : > { %532 = vadd.xlane.f32.xlu0 %v1850_v2  ;;  %v386_v5 = vld [vmem:[%s1861_s30 + $0x8] sm:$0xff]  ;;  %v385_v6 = vld [vmem:[%s1861_s30] sm:$0xff]  ;;  %v387_v7 = vld [vmem:[%s1861_s30 + $0x10] sm:$0xff]  ;;  %s1872_s15 = scalar_lea.vmem %s2058_s1, %s1230_s8  ;;  %s2094_s18 = smov (!%p355_p7, %s354_s18), 5 }
  0x5d   : > { %540 = vadd.xlane.f32.xlu1 %v537_v4  ;;  %v388_v9 = vld [vmem:[%s1861_s30 + $0x18] sm:$0xff]  ;;  %v380_v10 = vld [vmem:[%s1872_s15 + $0x50] sm:$0xff]  ;;  %v378_v13 = vld [vmem:[%s1872_s15 + $0x40] sm:$0xff]  ;;  %s1231_s14 = sshll.u32 %s2094_s18, 3  ;;  %s346_s17 = scalar_lea.vmem [#allocation8], %s1226_s13 }
  0x5e   : > { %v381_v11 = vld [vmem:[%s1872_s15 + $0x58] sm:$0xff]  ;;  %v379_v14 = vld [vmem:[%s1872_s15 + $0x48] sm:$0xff]  ;;  %s358_s27 = scalar_lea.vmem %s2059_s2, %s1231_s14  ;;  %s1089_s19 = sshll.u32 %s346_s17, 4  ;;  %s2008_s19 = int_to_ptr.vmem [resolvable:$true] %s1089_s19 }
  0x5f   : > { %v569_v12 = vpack.c.bf16 %v381_v11, %v380_v10  ;;  %v568_v16 = vpack.c.bf16 %v379_v14, %v378_v13  ;;  %v1888_v20 = vld [vmem:[%s358_s27] ss:$0 sm:$0xff]  ;;  %v1890_v21 = vld [vmem:[%s358_s27 + $0x8] ss:$0 sm:$0xff]  ;;  %v1241_v22 = vld [vmem:[%s358_s27 + $0x10] ss:$0 sm:$0xff] }
  0x60   : > { %vm466_vm1 = vcmp.eq.s32.totalorder %v1878_v15, %v1888_v20  ;;  %vm467_vm2 = vcmp.eq.s32.totalorder %v1881_v17, %v1888_v20  ;;  %vm479_vm3 = vcmp.eq.s32.totalorder %v1878_v15, %v1241_v22  ;;  %vm480_vm4 = vcmp.eq.s32.totalorder %v1881_v17, %v1241_v22  ;;  %v372_v11 = vld [vmem:[%s1872_s15 + $0x10] sm:$0xff]  ;;  %s1076_s13 = scalar_lea.sflag [#allocation4], %s1833_s12  ;;  %s1582_s10 = scalar_lea.vmem %s2008_s19, 256 }
  0x61   : > { %1324 = vmatprep.subr.bf16.mxu0 %v569_v12  ;;  %v1242_v24 = vsel %vm479_vm3, 1.0, %v1660_v23  ;;  %v1243_v25 = vsel %vm480_vm4, 1.0, %v1660_v23  ;;  %vm523_vm5 = vcmp.eq.s32.totalorder %v1878_v15, %v1890_v21  ;;  %vm524_vm6 = vcmp.eq.s32.totalorder %v1881_v17, %v1890_v21  ;;  %v1486_v17 = vld [vmem:[#allocation7 + $0x78] sm:$0xff]   ;;  %v1487_v21 = vld [vmem:[#allocation7 + $0x70] sm:$0xff]   ;;  %p1583_p12 = scmp.ne.s32.totalorder %s2008_s19, %s1582_s10  ;;  %p2082_p13 = scmp.ne.s32.totalorder %s2074_s11, 0 }
  0x62   : > { %1325 = vmatpush3.bf16.msra.mxu0 %v569_v12  ;;  %v491_v26 = vpack.c.bf16 %v1243_v25, %v1242_v24  ;;  %vm481_vm7 = vcmp.eq.s32.totalorder %v473_v18, %v1241_v22  ;;  %vm482_vm8 = vcmp.eq.s32.totalorder %v474_v19, %v1241_v22  ;;  %v373_v12 = vld [vmem:[%s1872_s15 + $0x18] sm:$0xff]  ;;  %v370_v19 = vld [vmem:[%s1872_s15] sm:$0xff]  ;;  %v371_v22 = vld [vmem:[%s1872_s15 + $0x8] sm:$0xff] }
  0x63   : > { %1326 = vmatprep.subr.bf16.mxu0 %v568_v16  ;;  %v1244_v27 = vsel %vm481_vm7, 1.0, %v1660_v23  ;;  %v1245_v28 = vsel %vm482_vm8, 1.0, %v1660_v23  ;;  %p1584_p0 = pnand %p1583_p12, %p2082_p13 }
  0x64   : > { %1328 = vmatprep.mubr.msk.bf16.mxu0 %vm570_vm0, %v491_v26  ;;  %v492_v29 = vpack.c.bf16 %v1245_v28, %v1244_v27 }
  0x65   : > { %p1585_p5 = pneg %p1584_p0 }
  0x66   : > { %1327 = vmatpush3.bf16.msra.mxu0 %v568_v16 }
  0x67   : > { %1338 = vmatprep.subr.bf16.mxu0 %v1660_v23 }
  0x69   : > { %1329 = vmatmul.mubr.msk.bf16.vlgmr.msra.gmra.mxu0 %vm570_vm0, %v492_v29 }
  0x6a   : > { %1342 = vmatprep.mubr.msk.bf16.mxu0 %vm1661_vm14, %v1660_v23 }
  0x6e   : > { %437 = vperm.xlu1 %1477, %v386_v5  }
  0x72   : > { %434 = vperm.xlu0 %1476, %v385_v6   ;;  %440 = vperm.xlu1 %1477, %v387_v7   ;;  %v1239_v6 = vsel %vm466_vm1, 1.0, %v1660_v23  ;;  %v1240_v7 = vsel %vm467_vm2, 1.0, %v1660_v23 }
  0x73   : > { %v472_v8 = vpack.c.bf16 %v1240_v7, %v1239_v6 }
  0x76   : > { %443 = vperm.xlu1 %1477, %v388_v9  }
  0xe1   : > { %v531_v30 = vpop.xlane.xlu0 %530 }
  0xe2   : > { %v534_v31 = vmul.f32 0.03125, %v531_v30  ;;  %v539_v32 = vpop.xlane.xlu1 %538 }
  0xe3   : > { %v542_v34 = vmul.f32 0.03125, %v539_v32 }
  0xe4   : > { %v544_v33 = vmul.f32 %v534_v31, %v534_v31  ;;  %v552_v50 = vsub.f32 %v1848_v1, %v534_v31 }
  0xe5   : > { %v533_v35 = vpop.xlane.xlu0 %532 }
  0xe6   : > { %v546_v36 = vsub.f32 %v542_v34, %v544_v33  ;;  %v535_v37 = vmul.f32 0.03125, %v533_v35  ;;  %v541_v38 = vpop.xlane.xlu1 %540  ;;  %v1478_v35 = vld [vmem:[#allocation7 + $0x38] sm:$0xff]  }
  0xe7   : > { %v543_v41 = vmul.f32 0.03125, %v541_v38  ;;  %v1481_v38 = vld [vmem:[#allocation7 + $0x20] sm:$0xff]  }
  0xe8   : > { %v548_v39 = vadd.f32 1e-05, %v546_v36  ;;  %v545_v40 = vmul.f32 %v535_v37, %v535_v37  ;;  %v553_v55 = vsub.f32 %v1850_v2, %v535_v37  ;;  %v1479_v36 = vld [vmem:[#allocation7 + $0x30] sm:$0xff]   ;;  %v1480_v37 = vld [vmem:[#allocation7 + $0x28] sm:$0xff]  }
  0xea   : > { %1494 = vrsqrt.f32 %v548_v39  ;;  %v547_v43 = vsub.f32 %v543_v41, %v545_v40  ;;  %v438_v44 = vpop.permute.xlu1 %437  ;;  %v1482_v39 = vld [vmem:[#allocation7 + $0x18] sm:$0xff]   ;;  %v1483_v40 = vld [vmem:[#allocation7 + $0x10] sm:$0xff]   ;;  %v1484_v41 = vld [vmem:[#allocation7 + $0x8] sm:$0xff]  }
  0xeb   : > { %vm446_vm9 = vcmp.eq.s32.totalorder %v1909_v42, %v438_v44 }
  0xec   : > { %v549_v45 = vadd.f32 1e-05, %v547_v43  ;;  %v1235_v46 = vsel %vm446_vm9, 1.0, %v1660_v23  ;;  %v1485_v43 = vld [vmem:[#allocation7] sm:$0xff]  }
  0xed   : > { %v435_v47 = vpop.permute.xlu0 %434 }
  0xee   : > { %1496 = vrsqrt.f32 %v549_v45  ;;  %vm445_vm10 = vcmp.eq.s32.totalorder %v1909_v42, %v435_v47  ;;  %v441_v52 = vpop.permute.xlu1 %440 }
  0xef   : > { %v1234_v48 = vsel %vm445_vm10, 1.0, %v1660_v23  ;;  %vm447_vm12 = vcmp.eq.s32.totalorder %v1909_v42, %v441_v52 }
  0xf0   : > { %v457_v49 = vpack.c.bf16 %v1235_v46, %v1234_v48  ;;  %v1236_v3 = vsel %vm447_vm12, 1.0, %v1660_v23 }
  0xf2   : > { %1334 = vmatprep.mubr.msk.bf16.mxu1 %vm633_vm11, %v457_v49  ;;  %v444_v59 = vpop.permute.xlu1 %443  ;;  %v1260_v49 = vld [vmem:[#allocation5 + $0x20] ss:$0 sm:$0xff] }
  0xf3   : > { %vm448_vm13 = vcmp.eq.s32.totalorder %v1909_v42, %v444_v59  ;;  %v389_v59 = vld [vmem:[%s1861_s30 + $0x20] sm:$0xff] }
  0xf4   : > { %v1237_v4 = vsel %vm448_vm13, 1.0, %v1660_v23 }
  0xf5   : > { %v458_v5 = vpack.c.bf16 %v1237_v4, %v1236_v3 }
  0xf7   : > { %v1495_v51 = vpop.eup %1494 }
  0xf8   : > { %v554_v53 = vmul.f32 %v1495_v51, %v552_v50 }
  0xfa   : > { %v560_v58 = vmul.f32 %v1253_v54, %v554_v53 }
  0xfb   : > { %v1497_v56 = vpop.eup %1496 }
  0xfc   : > { %v555_v57 = vmul.f32 %v1497_v56, %v553_v55  ;;  %v566_v62 = vadd.f32 %v1254_v60, %v560_v58 }
  0xfe   : > { %v561_v61 = vmul.f32 %v1253_v54, %v555_v57 }
 0x100   : > { %v567_v63 = vadd.f32 %v1254_v60, %v561_v61  ;;  %v391_v60 = vld [vmem:[%s1861_s30 + $0x30] sm:$0xff] }
 0x102   : > { %v632_v0 = vpack.c.bf16 %v567_v63, %v566_v62  ;;  %v392_v62 = vld [vmem:[%s1861_s30 + $0x38] sm:$0xff] }
 0x104   : > { %1332 = vmatprep.subr.bf16.mxu1 %v632_v0 }
 0x105   : > { %1333 = vmatpush3.bf16.msra.mxu1 %v632_v0 }
 0x108   : > { %1335 = vmatmul.mubr.msk.bf16.vlgmr.msra.gmra.mxu1 %vm633_vm11, %v458_v5 }
 0x129   : > { %v1330_v9 = vpop.f32.mrf.mxu0 }
 0x12a   : > { %v628_v16 = vadd.f32 %v1330_v9, %v372_v11 }
 0x12b   : > { %v611_v10 = vpop.f32.mrf.mxu0 }
 0x12c   : > { %v626_v20 = vadd.f32 %v611_v10, %v370_v19 }
 0x12d   : > { %v1331_v13 = vpop.f32.mrf.mxu0 }
 0x12e   : > { %v629_v18 = vadd.f32 %v1331_v13, %v373_v12 }
 0x12f   : > { %v614_v24 = vpop.f32.mrf.mxu0 }
 0x130   : > { %v631_v27 = vpack.c.bf16 %v629_v18, %v628_v16  ;;  %v627_v28 = vadd.f32 %v614_v24, %v371_v22 }
 0x132   : > { %v630_v33 = vpack.c.bf16 %v627_v28, %v626_v20 }
 0x1c8   : > { %v1336_v14 = vpop.f32.mrf.mxu1 }
 0x1ca   : > { %v674_v25 = vpop.f32.mrf.mxu1 }
 0x1cc   : > { %v1337_v26 = vpop.f32.mrf.mxu1 }
 0x1cd   : > { %v690_v29 = vpack.c.bf16 %v1337_v26, %v1336_v14 }
 0x1ce   : > { %v677_v30 = vpop.f32.mrf.mxu1 }
 0x1cf   : > { %v692_v31 = vmul.bf16 %v690_v29, %v631_v27  ;;  %v689_v32 = vpack.c.bf16 %v677_v30, %v674_v25  ;;  %v1269_v27 = vld [vmem:[#allocation5 + $0x10] ss:$0 sm:$0xff] }
 0x1d1   : > { %1339 = vmatpush3.bf16.msra.mxu0 %v692_v31  ;;  %v691_v34 = vmul.bf16 %v689_v32, %v630_v33  ;;  %v1270_v33 = vld [vmem:[#allocation5 + $0x18] ss:$0 sm:$0xff] }
 0x1d2   : > { %1340 = vmatprep.subr.bf16.mxu0 %v1660_v23 }
 0x1d5   : > { %1341 = vmatpush3.bf16.msra.mxu0 %v691_v34 }
 0x1d6   : > { %1346 = vmatprep.subr.bf16.mxu0 %v1660_v23 }
 0x1d8   : > { %1343 = vmatmul.mubr.msk.bf16.vlgmr.msra.gmra.mxu0 %vm570_vm0, %v472_v8 }
 0x1d9   : > { %1347 = vmatpush3.bf16.msra.mxu0 %v1478_v35  ;;  %1362 = vmatprep.mubr.msk.bf16.mxu0 %vm1661_vm14, %v1660_v23 }
 0x1da   : > { %1348 = vmatprep.subr.bf16.mxu0 %v1660_v23 }
 0x1dd   : > { %1349 = vmatpush3.bf16.msra.mxu0 %v1479_v36 }
 0x1de   : > { %1350 = vmatprep.subr.bf16.mxu0 %v1660_v23 }
 0x1e1   : > { %1351 = vmatpush3.bf16.msra.mxu0 %v1480_v37 }
 0x1e2   : > { %1352 = vmatprep.subr.bf16.mxu0 %v1660_v23 }
 0x1e5   : > { %1353 = vmatpush3.bf16.msra.mxu0 %v1481_v38 }
 0x1e6   : > { %1354 = vmatprep.subr.bf16.mxu0 %v1660_v23 }
 0x1e9   : > { %1355 = vmatpush3.bf16.msra.mxu0 %v1482_v39 }
 0x1ea   : > { %1356 = vmatprep.subr.bf16.mxu0 %v1660_v23 }
 0x1ed   : > { %1357 = vmatpush3.bf16.msra.mxu0 %v1483_v40 }
 0x1ee   : > { %1358 = vmatprep.subr.bf16.mxu0 %v1660_v23 }
 0x1f1   : > { %1359 = vmatpush3.bf16.msra.mxu0 %v1484_v41  ;;  %v1252_v41 = vsel %vm524_vm6, 1.0, %v1660_v23 }
 0x1f2   : > { %1360 = vmatprep.subr.bf16.mxu0 %v1660_v23 }
 0x1f5   : > { %1361 = vmatpush3.bf16.msra.mxu0 %v1485_v43 }
 0x298   : > { %v730_v44 = vpop.f32.mrf.mxu0 }
 0x29a   : > { %v1344_v45 = vpop.f32.mrf.mxu0 }
 0x29b   : > { %v376_v45 = vld [vmem:[%s1872_s15 + $0x30] sm:$0xff] }
 0x29c   : > { %v733_v46 = vpop.f32.mrf.mxu0 }
 0x29d   : > { %v737_v47 = vpack.c.bf16 %v733_v46, %v730_v44  ;;  %v377_v46 = vld [vmem:[%s1872_s15 + $0x38] sm:$0xff] }
 0x29e   : > { %v1345_v48 = vpop.f32.mrf.mxu0 }
 0x29f   : > { %1363 = vmatmul.mubr.bf16.vlgmr.msra.gmra.mxu0 %v737_v47  ;;  %v930_v48 = vpack.c.bf16 %v377_v46, %v376_v45 }
 0x35f   : > { %v824_v50 = vpop.f32.mrf.mxu0 }
 0x360   : > { %v825_v51 = vadd.f32 %v1260_v49, %v824_v50  ;;  %v374_v50 = vld [vmem:[%s1872_s15 + $0x20] sm:$0xff] }
 0x361   : > { %v1364_v52 = vpop.f32.mrf.mxu0 }
 0x362   : > { %v1950_v53 = vadd.f32 %v825_v51, %v1848_v1  ;;  %v390_v1 = vld [vmem:[%s1861_s30 + $0x28] sm:$0xff]  ;;  %s1289_s30 = sshll.u32 %s1721_s25, 8  ;;  %s1662_s25 = smov [#allocation8]  }
 0x363   : > { %v827_v54 = vpop.f32.mrf.mxu0  ;;  %v375_v51 = vld [vmem:[%s1872_s15 + $0x28] sm:$0xff]  ;;  %s2013_s8 = scalar_lea.hbm %s2063_s6, %s1289_s30  ;;  %s1586_s7 = sshll.u32 %s1662_s25, 4  ;;  %s1587_s7 = int_to_ptr.vmem [resolvable:$false] %s1586_s7 }
 0x364   : > { %v828_v55 = vadd.f32 %v1260_v49, %v827_v54  ;;  %833 = vadd.xlane.f32.xlu1 %v1950_v53  ;;  %v839_v58 = vmul.f32 %v1950_v53, %v1950_v53  ;;  %v929_v15 = vpack.c.bf16 %v375_v51, %v374_v50  ;;  %s1588_s15 = scalar_lea.vmem %s1587_s7, 512  ;;  %p1589_p3 = scmp.lt.s32.totalorder %s2008_s19, %s1587_s7 }
 0x365   : > { %v1365_v56 = vpop.f32.mrf.mxu0  ;;  %p1590_p11 = scmp.lt.s32.totalorder %s1588_s15, %s1582_s10 }
 0x366   : > { %v1954_v57 = vadd.f32 %v828_v55, %v1850_v2 }
 0x367   : > { %p1591_p9 = por %p1590_p11, %p1589_p3 }
 0x368   : > { %841 = vadd.xlane.f32.xlu1 %v839_v58  ;;  %835 = vadd.xlane.f32.xlu0 %v1954_v57  ;;  %v840_v61 = vmul.f32 %v1954_v57, %v1954_v57 }
 0x369   : > { %p1592_p1 = pnand %p1591_p9, %p1585_p5 }
 0x379   : > { %494 = vperm.xlu1 %1477, %v389_v59   ;;  %v1488_v59 = vld [vmem:[#allocation7 + $0x68] sm:$0xff]  }
 0x37d   : > { %500 = vperm.xlu1 %1477, %v391_v60   ;;  %v1489_v60 = vld [vmem:[#allocation7 + $0x60] sm:$0xff]  }
 0x37e   : > { %497 = vperm.xlu0 %1476, %v390_v1   ;;  %v1490_v1 = vld [vmem:[#allocation7 + $0x58] sm:$0xff]  }
 0x3a1   : > { %843 = vadd.xlane.f32.xlu1 %v840_v61  ;;  %v1491_v61 = vld [vmem:[#allocation7 + $0x50] sm:$0xff]  }
 0x3b2   : > { %503 = vperm.xlu1 %1477, %v392_v62   ;;  %v1492_v62 = vld [vmem:[#allocation7 + $0x48] sm:$0xff]  }
 0x3ed   : > { %v834_v2 = vpop.xlane.xlu1 %833 }
 0x3ee   : > { %v837_v8 = vmul.f32 0.03125, %v834_v2  ;;  %v1493_v2 = vld [vmem:[#allocation7 + $0x40] sm:$0xff]  }
 0x3f0   : > { %v847_v10 = vmul.f32 %v837_v8, %v837_v8  ;;  %v855_v26 = vsub.f32 %v1950_v53, %v837_v8 }
 0x3f1   : > { %v842_v63 = vpop.xlane.xlu1 %841  ;;  %v836_v0 = vpop.xlane.xlu0 %835 }
 0x3f2   : > { %v845_v9 = vmul.f32 0.03125, %v842_v63  ;;  %v838_v14 = vmul.f32 0.03125, %v836_v0 }
 0x3f4   : > { %v849_v11 = vsub.f32 %v845_v9, %v847_v10  ;;  %v848_v18 = vmul.f32 %v838_v14, %v838_v14  ;;  %v856_v28 = vsub.f32 %v1954_v57, %v838_v14 }
 0x3f5   : > { %v495_v3 = vpop.permute.xlu1 %494 }
 0x3f6   : > { %vm505_vm15 = vcmp.eq.s32.totalorder %v1909_v42, %v495_v3  ;;  %v851_v13 = vadd.f32 1e-05, %v849_v11 }
 0x3f7   : > { %v1246_v5 = vsel %vm505_vm15, 1.0, %v1660_v23 }
 0x3f8   : > { %1498 = vrsqrt.f32 %v851_v13 }
 0x3f9   : > { %v498_v4 = vpop.permute.xlu0 %497  ;;  %v501_v12 = vpop.permute.xlu1 %500 }
 0x3fa   : > { %vm506_vm1 = vcmp.eq.s32.totalorder %v1909_v42, %v498_v4  ;;  %vm507_vm3 = vcmp.eq.s32.totalorder %v1909_v42, %v501_v12 }
 0x3fb   : > { %v1247_v6 = vsel %vm506_vm1, 1.0, %v1660_v23  ;;  %v1248_v39 = vsel %vm507_vm3, 1.0, %v1660_v23 }
 0x3fc   : > { %v517_v7 = vpack.c.bf16 %v1247_v6, %v1246_v5  ;;  %v1274_v6 = vld [vmem:[#allocation5 + $0x28] ss:$0 sm:$0xff] }
 0x3fe   : > { %1368 = vmatprep.mubr.msk.bf16.mxu1 %vm633_vm11, %v517_v7 }
 0x405   : > { %v1499_v25 = vpop.eup %1498 }
 0x406   : > { %v857_v20 = vmul.f32 %v1499_v25, %v855_v26 }
 0x408   : > { %v863_v31 = vmul.f32 %v1269_v27, %v857_v20 }
 0x40a   : > { %v869_v35 = vadd.f32 %v1270_v33, %v863_v31 }
 0x42a   : > { %v844_v16 = vpop.xlane.xlu1 %843 }
 0x42b   : > { %v846_v19 = vmul.f32 0.03125, %v844_v16 }
 0x42d   : > { %v850_v22 = vsub.f32 %v846_v19, %v848_v18 }
 0x42e   : > { %v504_v32 = vpop.permute.xlu1 %503 }
 0x42f   : > { %v852_v24 = vadd.f32 1e-05, %v850_v22  ;;  %vm508_vm2 = vcmp.eq.s32.totalorder %v1909_v42, %v504_v32  ;;  %v1251_v42 = vsel %vm523_vm5, 1.0, %v1660_v23 }
 0x430   : > { %v1249_v38 = vsel %vm508_vm2, 1.0, %v1660_v23  ;;  %v529_v43 = vpack.c.bf16 %v1252_v41, %v1251_v42 }
 0x431   : > { %1500 = vrsqrt.f32 %v852_v24  ;;  %v518_v40 = vpack.c.bf16 %v1249_v38, %v1248_v39 }
 0x43e   : > { %v1501_v29 = vpop.eup %1500 }
 0x43f   : > { %v858_v30 = vmul.f32 %v1501_v29, %v856_v28 }
 0x441   : > { %v864_v34 = vmul.f32 %v1269_v27, %v858_v30 }
 0x443   : > { %v870_v36 = vadd.f32 %v1270_v33, %v864_v34 }
 0x445   : > { %v871_v37 = vpack.c.bf16 %v870_v36, %v869_v35 }
 0x447   : > { %1366 = vmatprep.subr.bf16.mxu1 %v871_v37 }
 0x448   : > { %1367 = vmatpush3.bf16.msra.mxu1 %v871_v37 }
 0x449   : > { %1372 = vmatprep.subr.bf16.mxu1 %v1660_v23 }
 0x44b   : > { %1369 = vmatmul.mubr.msk.bf16.vlgmr.msra.gmra.mxu1 %vm633_vm11, %v518_v40 }
 0x44c   : > { %1376 = vmatprep.mubr.msk.bf16.mxu1 %vm1661_vm14, %v1660_v23 }
 0x50b   : > { %v1370_v44 = vpop.f32.mrf.mxu1 }
 0x50d   : > { %v912_v47 = vpop.f32.mrf.mxu1 }
 0x50f   : > { %v1371_v49 = vpop.f32.mrf.mxu1 }
 0x510   : > { %v928_v52 = vpack.c.bf16 %v1371_v49, %v1370_v44 }
 0x511   : > { %v915_v54 = vpop.f32.mrf.mxu1 }
 0x512   : > { %v932_v55 = vmul.bf16 %v930_v48, %v928_v52  ;;  %v927_v56 = vpack.c.bf16 %v915_v54, %v912_v47 }
 0x514   : > { %1373 = vmatpush3.bf16.msra.mxu1 %v932_v55  ;;  %v931_v58 = vmul.bf16 %v929_v15, %v927_v56 }
 0x515   : > { %1374 = vmatprep.subr.bf16.mxu1 %v1660_v23 }
 0x518   : > { %1375 = vmatpush3.bf16.msra.mxu1 %v931_v58 }
 0x519   : > { %1380 = vmatprep.subr.bf16.mxu1 %v1660_v23 }
 0x51b   : > { %1377 = vmatmul.mubr.msk.bf16.vlgmr.msra.gmra.mxu1 %vm570_vm0, %v529_v43 }
 0x51c   : > { %1381 = vmatpush3.bf16.msra.mxu1 %v1486_v17  ;;  %1396 = vmatprep.mubr.msk.bf16.mxu1 %vm1661_vm14, %v1660_v23 }
 0x51d   : > { %1382 = vmatprep.subr.bf16.mxu1 %v1660_v23 }
 0x520   : > { %1383 = vmatpush3.bf16.msra.mxu1 %v1487_v21 }
 0x521   : > { %1384 = vmatprep.subr.bf16.mxu1 %v1660_v23 }
 0x524   : > { %1385 = vmatpush3.bf16.msra.mxu1 %v1488_v59 }
 0x525   : > { %1386 = vmatprep.subr.bf16.mxu1 %v1660_v23 }
 0x528   : > { %1387 = vmatpush3.bf16.msra.mxu1 %v1489_v60 }
 0x529   : > { %1388 = vmatprep.subr.bf16.mxu1 %v1660_v23 }
 0x52c   : > { %1389 = vmatpush3.bf16.msra.mxu1 %v1490_v1 }
 0x52d   : > { %1390 = vmatprep.subr.bf16.mxu1 %v1660_v23 }
 0x530   : > { %1391 = vmatpush3.bf16.msra.mxu1 %v1491_v61 }
 0x531   : > { %1392 = vmatprep.subr.bf16.mxu1 %v1660_v23 }
 0x534   : > { %1393 = vmatpush3.bf16.msra.mxu1 %v1492_v62 }
 0x535   : > { %1394 = vmatprep.subr.bf16.mxu1 %v1660_v23 }
 0x538   : > { %1395 = vmatpush3.bf16.msra.mxu1 %v1493_v2 }
 0x5db   : > { %v970_v63 = vpop.f32.mrf.mxu1 }
 0x5dd   : > { %v1378_v0 = vpop.f32.mrf.mxu1 }
 0x5df   : > { %v973_v3 = vpop.f32.mrf.mxu1 }
 0x5e0   : > { %v977_v4 = vpack.c.bf16 %v973_v3, %v970_v63 }
 0x5e1   : > { %v1379_v5 = vpop.f32.mrf.mxu1 }
 0x5e2   : > { %1397 = vmatmul.mubr.bf16.vlgmr.msra.gmra.mxu1 %v977_v4 }
 0x6a2   : > { %v1064_v7 = vpop.f32.mrf.mxu1 }
 0x6a3   : > { %v1065_v8 = vadd.f32 %v1274_v6, %v1064_v7 }
 0x6a4   : > { %v1398_v9 = vpop.f32.mrf.mxu1 }
 0x6a5   : > { %v1071_v23 = vadd.f32 %v1065_v8, %v1950_v53 }
 0x6a6   : > { %v1067_v10 = vpop.f32.mrf.mxu1 }
 0x6a7   : > { %1073 = vst [vmem:[%s346_s17] sm:$0xff] %v1071_v23  ;;  %v1068_v11 = vadd.f32 %v1274_v6, %v1067_v10 }
 0x6a8   : > { %v1399_v12 = vpop.f32.mrf.mxu1 }
 0x6a9   : > { %v1072_v13 = vadd.f32 %v1068_v11, %v1954_v57 }
 0x6ab   : > { %1074 = vst [vmem:[%s346_s17 + $0x8] sm:$0xff] %v1072_v13 }
 0x6ac   : > { %1595 = shalt.err (!%p1592_p1)
}
 0x6ad   : > { %s1596_s14 = scalar_lea.hbm %s2013_s8, 256  ;;  %s1600_s27 = scalar_lea.hbm %s2063_s6, 512 }
 0x6ae   : > { %p1597_p4 = scmp.ne.s32.totalorder %s2013_s8, %s1596_s14  ;;  %p1601_p10 = scmp.lt.s32.totalorder %s2013_s8, %s2063_s6 }
 0x6af   : > { %p1602_p2 = scmp.lt.s32.totalorder %s1600_s27, %s1596_s14 }
 0x6b0   : > { %p1598_p6 = pnand %p1597_p4, %p2082_p13 }
 0x6b1   : > { %p1603_p7 = por %p1602_p2, %p1601_p10 }
 0x6b2   : > { %p1599_p8 = pneg %p1598_p6 }
 0x6b4   : > { %p1604_p12 = pnand %p1603_p7, %p1599_p8 }
 0x6b6   : > { %1607 = shalt.err (!%p1604_p12)
}
 0x6b7   : > { %s1663_s16 = smov 128   ;;  %s1664_s18 = smov 8  }
 0x6b8   : > { %1410 = dma.vmem_to_hbm [thread:$0]  (%p2082_p13), %s2008_s19, 256, %s2013_s8, %s1076_s13, %s1663_s16, %s1663_s16, %s1664_s18  }
 0x6b9 PF: > { %s1104_s10 = sand.u32 1, %s1638_s21   ;;  %p2083_p0 = scmp.ne.s32.totalorder %s2071_s28, 0 }
 0x6ba   : > { %p2084_p5 = scmp.ge.s32.totalorder %s1650_s24, 2  ;;  %s1105_s25 = scalar_lea.sflag [#allocation4], %s1104_s10 }
 0x6bc   : > { %p1424_p3 = pnand %p2084_p5, %p2083_p0 }
 0x6be   : > { %p1425_p11 = pneg %p1424_p3 }
 0x6c0   : > { %1633 = dma.done.wait (%p1425_p11), %s1105_s25, 256  }
 0x6c1   : > { %1635 = vsyncadd (%p1425_p11), %s1105_s25, 4294967040  ;;  %p20_p9 = scmp.ge.s32.totalorder %s1775_s26, 4   ;;  %s2085_s21 = smov %s1642_s22 }
 0x6c2   : > { %s2086_s22 = smov %s1646_s23  ;;  %s2087_s23 = smov %s1784_s9 }
 0x6c3   : > { %s2088_s24 = smov %s1775_s26  ;;  %22 = sbr.rel (!%p20_p9) target bundleno = 6 (0x6), region = 106 }
 0x6c8   :  { %1110 = vsyncpa [#allocation3], 1 }
 0x6c9   :  { %1112 = vsyncpa [#allocation3 + $0x1], 1 }
 0x6ca   :  { %1113 = vsyncpa [#allocation6], 1 }
 0x6cb   :  { %1114 = vsyncpa [#allocation4], 1 }
 0x6cc   :  { %1116 = vsyncpa [#allocation4 + $0x1], 1 }

</bundles_post_ra>
